<compile_context>
chip_gen: v7x
topology: tpu7x:2x2x1
jax: 0.10.0
libtpu: 0.0.40
codegen_flags: <defaults>
</compile_context>

<pallas_src>
import math

import jax
import jax.numpy as jnp
from jax.experimental import pallas as pl
from jax.experimental.pallas import tpu as pltpu


def _round_up(x, m):
    return ((x + m - 1) // m) * m


def _make_kernel(num_layers, ln_eps, residual, compute_dtype=jnp.bfloat16):
    """num_layers = number of (Linear, LayerNorm) pairs; GELU after all but last."""

    def kernel(x_ref, *refs):
        o_ref = refs[-1]
        w_refs = refs[:-1]                      # 4 refs per layer: W^T, b, gamma, beta

        h = x_ref[...].astype(compute_dtype)    # bf16 operand for the first matmul
        for li in range(num_layers):            # static unroll (small, fixed depth)
            w_t, b, gamma, beta = w_refs[4 * li:4 * li + 4]
            # Linear: h @ W^T + b  (weights pre-transposed to [in, out], bf16 in,
            # f32 accumulate, f32 bias add).
            h = jnp.dot(h, w_t[...], preferred_element_type=jnp.float32) + b[...]
            # LayerNorm (one-sweep): var = E[h^2] - mean^2, rsqrt folded into gamma.
            inv_c = 1.0 / h.shape[-1]
            mean = jnp.sum(h, axis=-1, keepdims=True) * inv_c
            mean_sq = jnp.sum(h * h, axis=-1, keepdims=True) * inv_c
            var = mean_sq - mean * mean
            scale = gamma[...] * jax.lax.rsqrt(var + ln_eps)      # [tm, C]
            h = h * scale + (beta[...] - mean * scale)
            if li < num_layers - 1:
                h = jax.nn.gelu(h, approximate=True)              # activation
                # dropout: eval-mode identity
                h = h.astype(compute_dtype)     # bf16 operand for the next matmul

        if residual:
            # Re-load x here (short live range; cheap VMEM vld scheduled late).
            h = h + x_ref[...].astype(jnp.float32)

        o_ref[...] = h.astype(o_ref.dtype)

    return kernel


def _choose_row_tile(m, max_rows):
    """Padding-aware row tile: single tile when it fits, else MXU-aligned tiles."""
    if m <= max_rows:
        return _round_up(m, 8)
    n_tiles = -(-m // max_rows)                 # cdiv
    tm = _round_up(-(-m // n_tiles), 128)       # MXU-aligned for large M
    return min(tm, max_rows)


def mlp_layer(x, params, *, residual=False, ln_eps=1e-5, max_block_rows=512):
    """Apply the fused MLPLayer forward.

    x: [..., in_channels] float32.
    params: list of (W_t [in, out], b [1, out], gamma [1, out], beta [1, out]),
            all float32; W_t is cast to bf16 here (once, host side).
    """
    orig_shape = x.shape
    c_in = orig_shape[-1]
    c_out = params[-1][0].shape[1]
    max_width = max(w_t.shape[1] for (w_t, _, _, _) in params)
    if residual:
        assert c_in == c_out, "residual requires in_channels == out_channels"

    # Fold every leading dim into the matmul M dimension.
    x2 = x.reshape(-1, c_in)
    m = x2.shape[0]

    # Generation-aware VMEM budget (~85% of physical: ~56 MiB v7x, ~109 MiB v5e/v6e).
    try:
        phys_vmem = int(pltpu.get_tpu_info().vmem_capacity_bytes)
    except Exception:
        phys_vmem = 64 * 2**20
    vmem_cap = int(phys_vmem * 0.85)

    # bf16 resident weights (single-buffered), f32 bias / gamma / beta.
    flat_weights = []
    weight_bytes = 0
    for (w_t, b, gamma, beta) in params:
        w_bf16 = w_t.astype(jnp.bfloat16)
        for arr in (w_bf16, b, gamma, beta):
            flat_weights.append(arr)
            weight_bytes += arr.size * arr.dtype.itemsize

    def _vmem_estimate(tm_):
        act_bytes = 2 * tm_ * (c_in + c_out) * 4        # double-buffered x / out tiles
        hidden_bytes = 4 * tm_ * max_width * 4          # in-kernel f32 intermediates
        return weight_bytes + act_bytes + hidden_bytes + 4 * 2**20

    # Row tile: padding-aware, shrink if the VMEM estimate would not fit.
    tm = _choose_row_tile(m, max_block_rows)
    while tm > 8 and _vmem_estimate(tm) > vmem_cap:
        tm = max(8, _round_up(tm // 2, 8))

    m_pad = _round_up(m, tm)
    if m_pad != m:
        x2 = jnp.pad(x2, ((0, m_pad - m), (0, 0)))
    grid = (m_pad // tm,)

    # Input specs: x tiled over rows; all weights resident + single-buffered.
    in_specs = [pl.BlockSpec((tm, c_in), lambda i: (i, 0))]
    for arr in flat_weights:
        r, c = arr.shape
        in_specs.append(pl.BlockSpec((r, c), lambda i: (0, 0),
                                     pipeline_mode=pl.Buffered(1)))

    # Advisory cost estimate for the XLA scheduler.
    flops = sum(2 * m_pad * w_t.shape[0] * w_t.shape[1] for (w_t, _, _, _) in params)
    transcendentals = sum(m_pad * w_t.shape[1] for (w_t, _, _, _) in params[:-1])
    bytes_accessed = (x2.size * x2.dtype.itemsize + m_pad * c_out * 4 + weight_bytes)
    cost = pl.CostEstimate(flops=flops, transcendentals=transcendentals,
                           bytes_accessed=bytes_accessed)

    vmem_limit = int(min(vmem_cap, max(8 * 2**20, _vmem_estimate(tm))))

    kernel = _make_kernel(len(params), ln_eps, residual)

    out = pl.pallas_call(
        kernel,
        out_shape=jax.ShapeDtypeStruct((m_pad, c_out), x.dtype),
        grid_spec=pltpu.PrefetchScalarGridSpec(
            num_scalar_prefetch=0,
            grid=grid,
            in_specs=in_specs,
            out_specs=pl.BlockSpec((tm, c_out), lambda i: (i, 0)),
        ),
        compiler_params=pltpu.CompilerParams(
            dimension_semantics=("parallel",),
            vmem_limit_bytes=vmem_limit,
        ),
        cost_estimate=cost,
    )(x2, *flat_weights)

    out = out[:m].reshape(orig_shape[:-1] + (c_out,))
    return out


def init_params(key, in_channels, hidden_channels, out_channels, layers=2):
    """nn.Linear default init (uniform +/- 1/sqrt(fan_in)); LN gamma=1, beta=0."""
    dims = [in_channels] + [hidden_channels] * (layers - 1) + [out_channels]
    keys = jax.random.split(key, 2 * (len(dims) - 1))
    params = []
    for li in range(len(dims) - 1):
        fan_in, fan_out = dims[li], dims[li + 1]
        bound = 1.0 / math.sqrt(fan_in)
        w = jax.random.uniform(keys[2 * li], (fan_out, fan_in), jnp.float32,
                               -bound, bound)
        b = jax.random.uniform(keys[2 * li + 1], (fan_out,), jnp.float32,
                               -bound, bound)
        params.append((w.T, b.reshape(1, fan_out),
                       jnp.ones((1, fan_out), jnp.float32),
                       jnp.zeros((1, fan_out), jnp.float32)))
    return params


def reference(x, params, residual=False, ln_eps=1e-5):
    """Pure-JAX reference of the MLPLayer forward (eval mode, bf16 matmul inputs
    with f32 accumulation -- mirrors the kernel's MXU numerics)."""
    h = x
    num_layers = len(params)
    for li, (w_t, b, gamma, beta) in enumerate(params):
        h = jnp.dot(h.astype(jnp.bfloat16), w_t.astype(jnp.bfloat16),
                    preferred_element_type=jnp.float32) + b
        mean = jnp.mean(h, axis=-1, keepdims=True)
        var = jnp.mean((h - mean) ** 2, axis=-1, keepdims=True)
        h = (h - mean) / jnp.sqrt(var + ln_eps) * gamma + beta
        if li < num_layers - 1:
            h = jax.nn.gelu(h, approximate=True)
    if residual:
        h = h + x
    return h


if __name__ == "__main__":
    # Module defaults: layers=2, dropout=0.2 (eval identity), use_layer_norm=True,
    # activation='gelu', residual=False.
    batch, seq = 2, 8
    in_channels, hidden_channels, out_channels = 16, 32, 16
    layers = 2
    residual = False

    key = jax.random.PRNGKey(0)
    kx, kp = jax.random.split(key)
    x = jax.random.normal(kx, (batch, seq, in_channels), jnp.float32)
    params = init_params(kp, in_channels, hidden_channels, out_channels, layers)

    out = mlp_layer(x, params, residual=residual)
    out = jax.block_until_ready(out)

    ref = reference(x, params, residual=residual)
    assert out.shape == (batch, seq, out_channels)
    assert jnp.allclose(out, ref, atol=5e-3, rtol=5e-3), "mismatch vs reference"

    print("KERNEL_OK")
</pallas_src>

<mosaic_0001>
module attributes {stable_mosaic.version = 11 : i64} {
  func.func @kernel(%arg0: i32, %arg1: memref<16x16xf32, #tpu.memory_space<vmem>>, %arg2: memref<16x32xbf16, #tpu.memory_space<vmem>>, %arg3: memref<1x32xf32, #tpu.memory_space<vmem>>, %arg4: memref<1x32xf32, #tpu.memory_space<vmem>>, %arg5: memref<1x32xf32, #tpu.memory_space<vmem>>, %arg6: memref<32x16xbf16, #tpu.memory_space<vmem>>, %arg7: memref<1x16xf32, #tpu.memory_space<vmem>>, %arg8: memref<1x16xf32, #tpu.memory_space<vmem>>, %arg9: memref<1x16xf32, #tpu.memory_space<vmem>>, %arg10: memref<16x16xf32, #tpu.memory_space<vmem>>) attributes {dimension_semantics = [#tpu.dimension_semantics<parallel>], iteration_bounds = array<i64: 1>, scalar_prefetch = 0 : i64, scratch_operands = 0 : i64, tpu.core_type = #tpu.core_type<tc>, window_params = [{transform_indices = @transform_0, window_bounds = array<i64: 16, 16>}, {pipeline_mode = #tpu.pipeline_mode<synchronous>, transform_indices = @transform_1, window_bounds = array<i64: 16, 32>}, {pipeline_mode = #tpu.pipeline_mode<synchronous>, transform_indices = @transform_2, window_bounds = array<i64: 1, 32>}, {pipeline_mode = #tpu.pipeline_mode<synchronous>, transform_indices = @transform_3, window_bounds = array<i64: 1, 32>}, {pipeline_mode = #tpu.pipeline_mode<synchronous>, transform_indices = @transform_4, window_bounds = array<i64: 1, 32>}, {pipeline_mode = #tpu.pipeline_mode<synchronous>, transform_indices = @transform_5, window_bounds = array<i64: 32, 16>}, {pipeline_mode = #tpu.pipeline_mode<synchronous>, transform_indices = @transform_6, window_bounds = array<i64: 1, 16>}, {pipeline_mode = #tpu.pipeline_mode<synchronous>, transform_indices = @transform_7, window_bounds = array<i64: 1, 16>}, {pipeline_mode = #tpu.pipeline_mode<synchronous>, transform_indices = @transform_8, window_bounds = array<i64: 1, 16>}, {transform_indices = @transform_9, window_bounds = array<i64: 16, 16>}]} {
    %c0 = arith.constant 0 : index
    %c0_0 = arith.constant 0 : index
    %0 = vector.load %arg1[%c0, %c0_0] : memref<16x16xf32, #tpu.memory_space<vmem>>, vector<16x16xf32>
    %1 = arith.truncf %0 : vector<16x16xf32> to vector<16x16xbf16>
    %c0_1 = arith.constant 0 : index
    %c0_2 = arith.constant 0 : index
    %2 = vector.load %arg2[%c0_1, %c0_2] : memref<16x32xbf16, #tpu.memory_space<vmem>>, vector<16x32xbf16>
    %cst = arith.constant dense<0.000000e+00> : vector<16x32xf32>
    %3 = tpu.matmul %1, %2, %cst {dimension_numbers = #tpu.dot_dimension_numbers<[1], [0], [0], [1], [0, 0, 1, 1], [], []>} : vector<16x16xbf16>, vector<16x32xbf16>, vector<16x32xf32> -> vector<16x32xf32>
    %c0_3 = arith.constant 0 : index
    %c0_4 = arith.constant 0 : index
    %4 = vector.load %arg3[%c0_3, %c0_4] : memref<1x32xf32, #tpu.memory_space<vmem>>, vector<1x32xf32>
    %5 = vector.broadcast %4 : vector<1x32xf32> to vector<16x32xf32>
    %6 = arith.addf %3, %5 : vector<16x32xf32>
    %cst_5 = arith.constant dense<0.000000e+00> : vector<16xf32>
    %7 = vector.multi_reduction <add>, %6, %cst_5 [1] : vector<16x32xf32> to vector<16xf32>
    %8 = vector.shape_cast %7 : vector<16xf32> to vector<16x1xf32>
    %cst_6 = arith.constant 3.125000e-02 : f32
    %9 = vector.broadcast %cst_6 : f32 to vector<16x1xf32>
    %10 = arith.mulf %8, %9 : vector<16x1xf32>
    %11 = arith.mulf %6, %6 : vector<16x32xf32>
    %cst_7 = arith.constant dense<0.000000e+00> : vector<16xf32>
    %12 = vector.multi_reduction <add>, %11, %cst_7 [1] : vector<16x32xf32> to vector<16xf32>
    %13 = vector.shape_cast %12 : vector<16xf32> to vector<16x1xf32>
    %cst_8 = arith.constant 3.125000e-02 : f32
    %14 = vector.broadcast %cst_8 : f32 to vector<16x1xf32>
    %15 = arith.mulf %13, %14 : vector<16x1xf32>
    %16 = arith.mulf %10, %10 : vector<16x1xf32>
    %17 = arith.subf %15, %16 : vector<16x1xf32>
    %c0_9 = arith.constant 0 : index
    %c0_10 = arith.constant 0 : index
    %18 = vector.load %arg4[%c0_9, %c0_10] : memref<1x32xf32, #tpu.memory_space<vmem>>, vector<1x32xf32>
    %cst_11 = arith.constant 9.99999974E-6 : f32
    %19 = vector.broadcast %cst_11 : f32 to vector<16x1xf32>
    %20 = arith.addf %17, %19 : vector<16x1xf32>
    %21 = math.rsqrt %20 : vector<16x1xf32>
    %22 = vector.broadcast %18 : vector<1x32xf32> to vector<16x32xf32>
    %23 = vector.broadcast %21 : vector<16x1xf32> to vector<16x32xf32>
    %24 = arith.mulf %22, %23 : vector<16x32xf32>
    %25 = arith.mulf %6, %24 : vector<16x32xf32>
    %c0_12 = arith.constant 0 : index
    %c0_13 = arith.constant 0 : index
    %26 = vector.load %arg5[%c0_12, %c0_13] : memref<1x32xf32, #tpu.memory_space<vmem>>, vector<1x32xf32>
    %27 = vector.broadcast %10 : vector<16x1xf32> to vector<16x32xf32>
    %28 = arith.mulf %27, %24 : vector<16x32xf32>
    %29 = vector.broadcast %26 : vector<1x32xf32> to vector<16x32xf32>
    %30 = arith.subf %29, %28 : vector<16x32xf32>
    %31 = arith.addf %25, %30 : vector<16x32xf32>
    %32 = arith.mulf %31, %31 : vector<16x32xf32>
    %33 = arith.mulf %31, %32 : vector<16x32xf32>
    %cst_14 = arith.constant 4.471500e-02 : f32
    %34 = vector.broadcast %cst_14 : f32 to vector<16x32xf32>
    %35 = arith.mulf %34, %33 : vector<16x32xf32>
    %36 = arith.addf %31, %35 : vector<16x32xf32>
    %cst_15 = arith.constant 0.797884583 : f32
    %37 = vector.broadcast %cst_15 : f32 to vector<16x32xf32>
    %38 = arith.mulf %37, %36 : vector<16x32xf32>
    %39 = math.tanh %38 : vector<16x32xf32>
    %cst_16 = arith.constant 1.000000e+00 : f32
    %40 = vector.broadcast %cst_16 : f32 to vector<16x32xf32>
    %41 = arith.addf %40, %39 : vector<16x32xf32>
    %cst_17 = arith.constant 5.000000e-01 : f32
    %42 = vector.broadcast %cst_17 : f32 to vector<16x32xf32>
    %43 = arith.mulf %42, %41 : vector<16x32xf32>
    %44 = arith.mulf %31, %43 : vector<16x32xf32>
    %45 = arith.truncf %44 : vector<16x32xf32> to vector<16x32xbf16>
    %c0_18 = arith.constant 0 : index
    %c0_19 = arith.constant 0 : index
    %46 = vector.load %arg6[%c0_18, %c0_19] : memref<32x16xbf16, #tpu.memory_space<vmem>>, vector<32x16xbf16>
    %cst_20 = arith.constant dense<0.000000e+00> : vector<16x16xf32>
    %47 = tpu.matmul %45, %46, %cst_20 {dimension_numbers = #tpu.dot_dimension_numbers<[1], [0], [0], [1], [0, 0, 1, 1], [], []>} : vector<16x32xbf16>, vector<32x16xbf16>, vector<16x16xf32> -> vector<16x16xf32>
    %c0_21 = arith.constant 0 : index
    %c0_22 = arith.constant 0 : index
    %48 = vector.load %arg7[%c0_21, %c0_22] : memref<1x16xf32, #tpu.memory_space<vmem>>, vector<1x16xf32>
    %49 = vector.broadcast %48 : vector<1x16xf32> to vector<16x16xf32>
    %50 = arith.addf %47, %49 : vector<16x16xf32>
    %cst_23 = arith.constant dense<0.000000e+00> : vector<16xf32>
    %51 = vector.multi_reduction <add>, %50, %cst_23 [1] : vector<16x16xf32> to vector<16xf32>
    %52 = vector.shape_cast %51 : vector<16xf32> to vector<16x1xf32>
    %cst_24 = arith.constant 6.250000e-02 : f32
    %53 = vector.broadcast %cst_24 : f32 to vector<16x1xf32>
    %54 = arith.mulf %52, %53 : vector<16x1xf32>
    %55 = arith.mulf %50, %50 : vector<16x16xf32>
    %cst_25 = arith.constant dense<0.000000e+00> : vector<16xf32>
    %56 = vector.multi_reduction <add>, %55, %cst_25 [1] : vector<16x16xf32> to vector<16xf32>
    %57 = vector.shape_cast %56 : vector<16xf32> to vector<16x1xf32>
    %cst_26 = arith.constant 6.250000e-02 : f32
    %58 = vector.broadcast %cst_26 : f32 to vector<16x1xf32>
    %59 = arith.mulf %57, %58 : vector<16x1xf32>
    %60 = arith.mulf %54, %54 : vector<16x1xf32>
    %61 = arith.subf %59, %60 : vector<16x1xf32>
    %c0_27 = arith.constant 0 : index
    %c0_28 = arith.constant 0 : index
    %62 = vector.load %arg8[%c0_27, %c0_28] : memref<1x16xf32, #tpu.memory_space<vmem>>, vector<1x16xf32>
    %cst_29 = arith.constant 9.99999974E-6 : f32
    %63 = vector.broadcast %cst_29 : f32 to vector<16x1xf32>
    %64 = arith.addf %61, %63 : vector<16x1xf32>
    %65 = math.rsqrt %64 : vector<16x1xf32>
    %66 = vector.broadcast %62 : vector<1x16xf32> to vector<16x16xf32>
    %67 = vector.broadcast %65 : vector<16x1xf32> to vector<16x16xf32>
    %68 = arith.mulf %66, %67 : vector<16x16xf32>
    %69 = arith.mulf %50, %68 : vector<16x16xf32>
    %c0_30 = arith.constant 0 : index
    %c0_31 = arith.constant 0 : index
    %70 = vector.load %arg9[%c0_30, %c0_31] : memref<1x16xf32, #tpu.memory_space<vmem>>, vector<1x16xf32>
    %71 = vector.broadcast %54 : vector<16x1xf32> to vector<16x16xf32>
    %72 = arith.mulf %71, %68 : vector<16x16xf32>
    %73 = vector.broadcast %70 : vector<1x16xf32> to vector<16x16xf32>
    %74 = arith.subf %73, %72 : vector<16x16xf32>
    %75 = arith.addf %69, %74 : vector<16x16xf32>
    %c0_32 = arith.constant 0 : index
    %c0_33 = arith.constant 0 : index
    %76 = vector.load %arg10[%c0_32, %c0_33] : memref<16x16xf32, #tpu.memory_space<vmem>>, vector<16x16xf32>
    tpu.vector_store %arg10[%c0_32, %c0_33], %75 {strides = array<i32>} : memref<16x16xf32, #tpu.memory_space<vmem>>, vector<16x16xf32>,
    return
  }
  func.func @transform_0(%arg0: i32) -> (i32, i32) {
    %c0_i32 = arith.constant 0 : i32
    %c0_i32_0 = arith.constant 0 : i32
    return %arg0, %c0_i32 : i32, i32
  }
  func.func @transform_1(%arg0: i32) -> (i32, i32) {
    %c0_i32 = arith.constant 0 : i32
    %c0_i32_0 = arith.constant 0 : i32
    %c0_i32_1 = arith.constant 0 : i32
    return %c0_i32, %c0_i32_0 : i32, i32
  }
  func.func @transform_2(%arg0: i32) -> (i32, i32) {
    %c0_i32 = arith.constant 0 : i32
    %c0_i32_0 = arith.constant 0 : i32
    %c0_i32_1 = arith.constant 0 : i32
    return %c0_i32, %c0_i32_0 : i32, i32
  }
  func.func @transform_3(%arg0: i32) -> (i32, i32) {
    %c0_i32 = arith.constant 0 : i32
    %c0_i32_0 = arith.constant 0 : i32
    %c0_i32_1 = arith.constant 0 : i32
    return %c0_i32, %c0_i32_0 : i32, i32
  }
  func.func @transform_4(%arg0: i32) -> (i32, i32) {
    %c0_i32 = arith.constant 0 : i32
    %c0_i32_0 = arith.constant 0 : i32
    %c0_i32_1 = arith.constant 0 : i32
    return %c0_i32, %c0_i32_0 : i32, i32
  }
  func.func @transform_5(%arg0: i32) -> (i32, i32) {
    %c0_i32 = arith.constant 0 : i32
    %c0_i32_0 = arith.constant 0 : i32
    %c0_i32_1 = arith.constant 0 : i32
    return %c0_i32, %c0_i32_0 : i32, i32
  }
  func.func @transform_6(%arg0: i32) -> (i32, i32) {
    %c0_i32 = arith.constant 0 : i32
    %c0_i32_0 = arith.constant 0 : i32
    %c0_i32_1 = arith.constant 0 : i32
    return %c0_i32, %c0_i32_0 : i32, i32
  }
  func.func @transform_7(%arg0: i32) -> (i32, i32) {
    %c0_i32 = arith.constant 0 : i32
    %c0_i32_0 = arith.constant 0 : i32
    %c0_i32_1 = arith.constant 0 : i32
    return %c0_i32, %c0_i32_0 : i32, i32
  }
  func.func @transform_8(%arg0: i32) -> (i32, i32) {
    %c0_i32 = arith.constant 0 : i32
    %c0_i32_0 = arith.constant 0 : i32
    %c0_i32_1 = arith.constant 0 : i32
    return %c0_i32, %c0_i32_0 : i32, i32
  }
  func.func @transform_9(%arg0: i32) -> (i32, i32) {
    %c0_i32 = arith.constant 0 : i32
    %c0_i32_0 = arith.constant 0 : i32
    return %arg0, %c0_i32 : i32, i32
  }
}

</mosaic_0001>

<bundles_post_ra>
// kernel: tpu_custom_call.1
= control target key start
LH: loop header
LB: loop body
LE: loop exit
PB: predicated region body
PF: predicated region fallthrough
CT: control target
= control target key end

     0   :  { %v376_v1 = vmov 0.0   ;;  %vm52_vm0 = vcmask 130048   ;;  %vm377_vm1 = vmmov 0   ;;  %s488_s0 = inlined_call_operand.vmem [shape: f32[16,16], index: 0, kind: input, shape index: {}]   ;;  %s489_s1 = inlined_call_operand.vmem [shape: bf16[16,32], index: 1, kind: input, shape index: {}]   ;;  %s490_s2 = inlined_call_operand.vmem [shape: f32[1,32], index: 2, kind: input, shape index: {}]   ;;  %s491_s3 = inlined_call_operand.vmem [shape: f32[1,32], index: 3, kind: input, shape index: {}]   ;;  %s492_s4 = inlined_call_operand.vmem [shape: f32[1,32], index: 4, kind: input, shape index: {}]   ;;  %s493_s5 = inlined_call_operand.vmem [shape: bf16[32,16], index: 5, kind: input, shape index: {}]   ;;  %s494_s6 = inlined_call_operand.vmem [shape: f32[1,16], index: 6, kind: input, shape index: {}]   ;;  %s495_s7 = inlined_call_operand.vmem [shape: f32[1,16], index: 7, kind: input, shape index: {}]   ;;  %s496_s8 = inlined_call_operand.vmem [shape: f32[1,16], index: 8, kind: input, shape index: {}]   ;;  %s497_s9 = inlined_call_operand.hbm [shape: f32[16,16], index: 9, kind: output, shape index: {}]  }
   0x1   :  { %v337_v0 = vld [vmem:[%s489_s1] sm:$0xff]   ;;  %318 = vmatprep.subr.bf16.mxu0 %v376_v1  ;;  %v35_v3 = vld [vmem:[%s488_s0 + $0x8] sm:$0xff]  ;;  %324 = vmatprep.subr.bf16.mxu1 %v376_v1 }
   0x2   :  { %v34_v2 = vld [vmem:[%s488_s0] sm:$0xff]  ;;  %319 = vmatpush3.bf16.msra.mxu0 %v337_v0  ;;  %320 = vmatprep.mubr.msk.bf16.mxu0 %vm377_vm1, %v376_v1 }
   0x3   :  { %v36_v4 = vpack.c.bf16 %v35_v3, %v34_v2  ;;  %328 = vmatprep.mubr.msk.bf16.mxu1 %vm377_vm1, %v376_v1 }
   0x4   :  { %14 = vsyncpa [#allocation3], 0  ;;  %v302_v5 = vld [vmem:[%s490_s2] ss:$0 sm:$0xff]  ;;  %vm97_vm2 = vcmask 261120   ;;  %v339_v19 = vld [vmem:[%s493_s5 + $0x8] sm:$0xff]  }
   0x5   :  { %321 = vmatmul.mubr.msk.bf16.vlgmr.msra.gmra.mrb[0].mxu0 %vm52_vm0, %v36_v4  ;;  %v338_v18 = vld [vmem:[%s493_s5] sm:$0xff]   ;;  %s378_s24 = smov [#allocation2]  }
   0x6   :  { %325 = vmatpush3.bf16.msra.mxu1 %v338_v18  ;;  %v305_v34 = vld [vmem:[%s491_s3] ss:$0 sm:$0xff]  ;;  %s291_s25 = sshll.u32 %s378_s24, 4  ;;  %s292_s25 = int_to_ptr.vmem [resolvable:$true] %s291_s25 }
   0x7   :  { %326 = vmatprep.subr.bf16.mxu1 %v376_v1  ;;  %v306_v37 = vld [vmem:[%s492_s4] ss:$0 sm:$0xff]  ;;  %p357_p1 = scmp.lt.s32.totalorder %s292_s25, %s292_s25 }
   0x8   :  { %v307_v3 = vld [vmem:[%s494_s6] ss:$0 sm:$0xff] }
   0xa   :  { %327 = vmatpush3.bf16.msra.mxu1 %v339_v19 }
  0xd8   :  { %v90_v6 = vpop.f32.mrb[0].mxu0 }
  0xd9   :  { %v91_v7 = vadd.f32 %v302_v5, %v90_v6  ;;  %v322_v8 = vpop.f32.mrb[1].mxu0 }
  0xda   :  { %v93_v9 = vpop.f32.mrb[2].mxu0 }
  0xdb   :  { %v94_v10 = vadd.f32 %v302_v5, %v93_v9  ;;  %v323_v11 = vpop.f32.mrb[3].mxu0  ;;  %v98_v12 = vsel %vm97_vm2, %v91_v7, 0.0  ;;  %v106_v13 = vmul.f32 %v91_v7, %v91_v7 }
  0xdc   :  { %99 = vadd.xlane.f32.xlu0 %v98_v12 }
  0xdd   :  { %v108_v14 = vsel %vm97_vm2, %v106_v13, 0.0  ;;  %v107_v15 = vmul.f32 %v94_v10, %v94_v10  ;;  %v101_v16 = vsel %vm97_vm2, %v94_v10, 0.0 }
  0xde   :  { %109 = vadd.xlane.f32.xlu1 %v108_v14 }
  0xdf   :  { %v111_v17 = vsel %vm97_vm2, %v107_v15, 0.0 }
  0xe0   :  { %102 = vadd.xlane.f32.xlu0 %v101_v16 }
  0xe2   :  { %112 = vadd.xlane.f32.xlu1 %v111_v17 }
 0x169   :  { %v100_v20 = vpop.xlane.xlu0 %99 }
 0x16a   :  { %v104_v21 = vmul.f32 0.03125, %v100_v20 }
 0x16b   :  { %v110_v22 = vpop.xlane.xlu1 %109 }
 0x16c   :  { %v116_v23 = vmul.f32 %v104_v21, %v104_v21  ;;  %v114_v24 = vmul.f32 0.03125, %v110_v22 }
 0x16d   :  { %v103_v25 = vpop.xlane.xlu0 %102 }
 0x16e   :  { %v118_v26 = vsub.f32 %v114_v24, %v116_v23  ;;  %v105_v27 = vmul.f32 0.03125, %v103_v25 }
 0x16f   :  { %v113_v28 = vpop.xlane.xlu1 %112 }
 0x170   :  { %v121_v29 = vadd.f32 1e-05, %v118_v26  ;;  %v117_v30 = vmul.f32 %v105_v27, %v105_v27  ;;  %v115_v31 = vmul.f32 0.03125, %v113_v28 }
 0x172   :  { %340 = vrsqrt.f32 %v121_v29  ;;  %v119_v32 = vsub.f32 %v115_v31, %v117_v30  ;;  %v311_v30 = vld [vmem:[%s495_s7] ss:$0 sm:$0xff]  ;;  %s352_s7 = scalar_lea.vmem %s292_s25, 256 }
 0x173   :  { %p353_p0 = scmp.ne.s32.totalorder %s292_s25, %s352_s7  ;;  %p358_p2 = scmp.lt.s32.totalorder %s352_s7, %s352_s7 }
 0x174   :  { %v122_v33 = vadd.f32 1e-05, %v119_v32 }
 0x175   :  { %p359_p3 = por %p358_p2, %p357_p1 }
 0x176   :  { %342 = vrsqrt.f32 %v122_v33 }
 0x177   :  { %p360_p4 = pnand %p359_p3, %p353_p0 }
 0x17c   :  { %v341_v35 = vpop.eup %340 }
 0x17d   :  { %v131_v36 = vmul.f32 %v341_v35, %v305_v34 }
 0x17f   :  { %v136_v38 = vmul.f32 %v131_v36, %v104_v21  ;;  %v133_v40 = vmul.f32 %v131_v36, %v91_v7 }
 0x180   :  { %v343_v39 = vpop.eup %342 }
 0x181   :  { %v144_v41 = vsub.f32 %v306_v37, %v136_v38  ;;  %v132_v42 = vmul.f32 %v343_v39, %v305_v34  ;;  %v312_v34 = vld [vmem:[%s496_s8] ss:$0 sm:$0xff] }
 0x183   :  { %v137_v43 = vmul.f32 %v132_v42, %v105_v27  ;;  %v146_v44 = vadd.f32 %v144_v41, %v133_v40  ;;  %v134_v45 = vmul.f32 %v132_v42, %v94_v10 }
 0x185   :  { %v145_v46 = vsub.f32 %v306_v37, %v137_v43  ;;  %v148_v47 = vmul.f32 %v146_v44, %v146_v44 }
 0x187   :  { %v147_v48 = vadd.f32 %v145_v46, %v134_v45  ;;  %v150_v49 = vmul.f32 %v148_v47, %v146_v44 }
 0x189   :  { %v149_v50 = vmul.f32 %v147_v48, %v147_v48  ;;  %v152_v51 = vmul.f32 0.044715, %v150_v49 }
 0x18b   :  { %v151_v52 = vmul.f32 %v149_v50, %v147_v48  ;;  %v154_v53 = vadd.f32 %v152_v51, %v146_v44 }
 0x18d   :  { %v153_v54 = vmul.f32 0.044715, %v151_v52  ;;  %v156_v55 = vmul.f32 0.7978846, %v154_v53 }
 0x18f   :  { %v155_v56 = vadd.f32 %v153_v54, %v147_v48  ;;  %344 = vtanh.f32 %v156_v55 }
 0x191   :  { %v157_v57 = vmul.f32 0.7978846, %v155_v56 }
 0x193   :  { %346 = vtanh.f32 %v157_v57 }
 0x199   :  { %v345_v58 = vpop.eup %344 }
 0x19a   :  { %v160_v59 = vadd.f32 1.0, %v345_v58 }
 0x19c   :  { %v162_v62 = vmul.f32 0.5, %v160_v59 }
 0x19d   :  { %v347_v60 = vpop.eup %346 }
 0x19e   :  { %v161_v61 = vadd.f32 1.0, %v347_v60  ;;  %v164_v0 = vmul.f32 %v162_v62, %v146_v44 }
 0x1a0   :  { %v163_v63 = vmul.f32 0.5, %v161_v61 }
 0x1a2   :  { %v165_v1 = vmul.f32 %v163_v63, %v147_v48 }
 0x1a4   :  { %v166_v2 = vpack.c.bf16 %v165_v1, %v164_v0 }
 0x1a6   :  { %329 = vmatmul.mubr.msk.bf16.vlgmr.msra.gmra.mrb[0].mxu1 %vm97_vm2, %v166_v2 }
 0x279   :  { %v227_v4 = vpop.f32.mrb[0].mxu1 }
 0x27a   :  { %v228_v5 = vadd.f32 %v307_v3, %v227_v4  ;;  %v330_v6 = vpop.f32.mrb[1].mxu1 }
 0x27b   :  { %v230_v7 = vpop.f32.mrb[2].mxu1 }
 0x27c   :  { %v231_v8 = vadd.f32 %v307_v3, %v230_v7  ;;  %v331_v9 = vpop.f32.mrb[3].mxu1  ;;  %v234_v10 = vsel %vm52_vm0, %v228_v5, 0.0  ;;  %v242_v11 = vmul.f32 %v228_v5, %v228_v5 }
 0x27d   :  { %235 = vadd.xlane.f32.xlu0 %v234_v10 }
 0x27e   :  { %v237_v12 = vsel %vm52_vm0, %v231_v8, 0.0  ;;  %v243_v13 = vmul.f32 %v231_v8, %v231_v8  ;;  %v244_v14 = vsel %vm52_vm0, %v242_v11, 0.0 }
 0x27f   :  { %238 = vadd.xlane.f32.xlu1 %v237_v12 }
 0x280   :  { %v247_v15 = vsel %vm52_vm0, %v243_v13, 0.0 }
 0x281   :  { %245 = vadd.xlane.f32.xlu0 %v244_v14 }
 0x283   :  { %248 = vadd.xlane.f32.xlu1 %v247_v15 }
 0x30a   :  { %v236_v16 = vpop.xlane.xlu0 %235 }
 0x30b   :  { %v240_v17 = vmul.f32 0.0625, %v236_v16 }
 0x30c   :  { %v239_v18 = vpop.xlane.xlu1 %238 }
 0x30d   :  { %v241_v19 = vmul.f32 0.0625, %v239_v18  ;;  %v252_v21 = vmul.f32 %v240_v17, %v240_v17 }
 0x30e   :  { %v246_v20 = vpop.xlane.xlu0 %245 }
 0x30f   :  { %v250_v22 = vmul.f32 0.0625, %v246_v20  ;;  %v253_v24 = vmul.f32 %v241_v19, %v241_v19 }
 0x310   :  { %v249_v23 = vpop.xlane.xlu1 %248 }
 0x311   :  { %v254_v25 = vsub.f32 %v250_v22, %v252_v21  ;;  %v251_v26 = vmul.f32 0.0625, %v249_v23 }
 0x313   :  { %v257_v27 = vadd.f32 1e-05, %v254_v25  ;;  %v255_v28 = vsub.f32 %v251_v26, %v253_v24 }
 0x315   :  { %348 = vrsqrt.f32 %v257_v27  ;;  %v258_v29 = vadd.f32 1e-05, %v255_v28 }
 0x317   :  { %350 = vrsqrt.f32 %v258_v29 }
 0x31f   :  { %v349_v31 = vpop.eup %348 }
 0x320   :  { %v267_v32 = vmul.f32 %v349_v31, %v311_v30 }
 0x321   :  { %v351_v33 = vpop.eup %350 }
 0x322   :  { %v268_v35 = vmul.f32 %v351_v33, %v311_v30  ;;  %v272_v36 = vmul.f32 %v267_v32, %v240_v17  ;;  %v269_v37 = vmul.f32 %v267_v32, %v228_v5 }
 0x324   :  { %v273_v38 = vmul.f32 %v268_v35, %v241_v19  ;;  %v280_v39 = vsub.f32 %v312_v34, %v272_v36  ;;  %v270_v40 = vmul.f32 %v268_v35, %v231_v8 }
 0x326   :  { %v281_v41 = vsub.f32 %v312_v34, %v273_v38  ;;  %v282_v42 = vadd.f32 %v280_v39, %v269_v37 }
 0x328   :  { %v283_v43 = vadd.f32 %v281_v41, %v270_v40  ;;  %284 = vst.msk [vmem:[#allocation2] sm:$0xff] %vm52_vm0, %v282_v42 }
 0x32a   :  { %285 = vst.msk [vmem:[#allocation2 + $0x8] sm:$0xff] %vm52_vm0, %v283_v43 }
 0x32b   :  { %363 = shalt.err (!%p360_p4)
}
 0x32c   :  { %s364_s27 = scalar_lea.hbm %s497_s9, 256 }
 0x32d   :  { %p365_p5 = scmp.ne.s32.totalorder %s497_s9, %s364_s27  ;;  %p368_p6 = scmp.lt.u32.totalorder %s364_s27, %s497_s9 }
 0x32f   :  { %p370_p7 = pnand %p368_p6, %p365_p5 }
 0x331   :  { %373 = shalt.err (!%p370_p7)
}
 0x332   :  { %s379_s11 = smov 128   ;;  %s380_s12 = smov 8  }
 0x333   :  { %297 = dma.vmem_to_hbm [thread:$0]  %s292_s25, 256, %s497_s9, [#allocation3], %s379_s11, %s379_s11, %s380_s12  }
 0x334   :  { %374 = dma.done.wait [#allocation3], 256  }
 0x335   :  { %375 = vsyncadd [#allocation3], 4294967040 }
 0x336   :  { %301 = vsyncpa [#allocation3], 1 }

</bundles_post_ra>
